<compile_context>
chip_gen: v7x
topology: tpu7x:2x2x1
jax: 0.10.0
libtpu: 0.0.40
codegen_flags: <defaults>
</compile_context>

<pallas_src>
import functools

import jax
import jax.numpy as jnp
from jax.experimental import pallas as pl
from jax.experimental.pallas import tpu as pltpu


def _round_up(n: int, m: int) -> int:
    return ((n + m - 1) // m) * m


def _make_agent_kernel(num_layers: int):
    """Kernel for an MLP with `num_layers` total Linear layers (>=1).

    refs: x_ref [blk_b, F_pad], w_ref [L, F_pad, F_pad],
          b_ref [L, F_pad], out_ref [blk_b, F_pad]
    """

    def kernel(x_ref, w_ref, b_ref, out_ref):
        h = x_ref[...]

        # Hidden layers: Linear + ReLU (MXU matmul + VPU max).
        for i in range(num_layers - 1):
            bias = b_ref[pl.ds(i, 1), :]                       # (1, F_pad)
            h = jnp.dot(h, w_ref[i], preferred_element_type=jnp.float32) + bias
            h = jnp.maximum(h, 0.0)

        # Output layer. Padded lanes carry a -1e30 bias -> exp() == 0 below.
        logits = (
            jnp.dot(h, w_ref[num_layers - 1], preferred_element_type=jnp.float32)
            + b_ref[pl.ds(num_layers - 1, 1), :]
        )

        # Numerically-stable softmax over dim=1 (features).
        m = jnp.max(logits, axis=1, keepdims=True)
        e = jnp.exp(logits - m)
        denom = jnp.sum(e, axis=1, keepdims=True)
        # EUP approximate reciprocal + one Newton step (restores ~f32 precision).
        r = pl.reciprocal(denom, approx=True)
        r = r * (2.0 - denom * r)
        out_ref[...] = e * r

    return kernel


def pack_agent_params(params):
    """Packs layer params into padded slabs. Call ONCE per parameter update.

    Args:
      params: list of (W[in, out], b[1, out]) tuples; last entry is the output
              layer. (W is the transpose of PyTorch's nn.Linear weight so the
              kernel computes x @ W.)
    Returns:
      (w_slab [L, F_pad, F_pad] f32, b_slab [L, F_pad] f32, out_dim)
    """
    num_layers = len(params)
    dims = [params[0][0].shape[0]] + [w.shape[1] for w, _ in params]
    out_dim = dims[-1]
    f_pad = max(_round_up(d, 128) for d in dims)

    w_slab = jnp.zeros((num_layers, f_pad, f_pad), jnp.float32)
    b_slab = jnp.zeros((num_layers, f_pad), jnp.float32)
    for i, (w, b) in enumerate(params):
        fi, fo = w.shape
        w_slab = w_slab.at[i, :fi, :fo].set(w.astype(jnp.float32))
        b_slab = b_slab.at[i, :fo].set(b.reshape(-1).astype(jnp.float32))
    if out_dim < f_pad:
        # Padded output lanes -> huge negative logit -> exp() == 0 in softmax.
        # (Safe in f32/bf16; never cast biases to fp16/fp8.)
        b_slab = b_slab.at[num_layers - 1, out_dim:].set(-1e30)
    return w_slab, b_slab, out_dim


@functools.partial(jax.jit, static_argnames=("out_dim", "block_b"))
def agent_forward(x, w_slab, b_slab, *, out_dim: int, block_b: int = 256):
    """Runs the Agent MLP forward pass; x: [B, in_dim] f32 -> [B, out_dim] probs."""
    assert block_b % 8 == 0 and block_b >= 8
    batch, in_dim = x.shape
    num_layers, f_pad = b_slab.shape

    # Tight batch tiling hugging the real batch; >=2 tiles when batch > 8 so
    # both v7x TensorCores get work (no effect on single-TC v5e/v6e).
    n_tiles = -(-batch // block_b)
    if batch > 8 and n_tiles < 2:
        n_tiles = 2
    blk_b = _round_up(-(-batch // n_tiles), 8)
    b_pad = n_tiles * blk_b
    grid = (n_tiles,)

    # Zero-pad the input (rows and feature lanes); fuses under jit.
    x_pad = jnp.zeros((b_pad, f_pad), jnp.float32)
    x_pad = x_pad.at[:batch, :in_dim].set(x.astype(jnp.float32))

    # Explicit VMEM budget: slabs (double-buffered worst case) + in/out tiles
    # (double-buffered) + headroom; floor at the 16 MiB v5e default, cap under
    # v7x's 64 MiB physical VMEM.
    w_bytes = num_layers * f_pad * f_pad * 4
    b_bytes = num_layers * f_pad * 4
    tile_bytes = blk_b * f_pad * 4
    vmem_limit = 2 * (w_bytes + b_bytes) + 4 * tile_bytes + (4 << 20)
    vmem_limit = int(min(max(vmem_limit, 16 << 20), 64 << 20))

    kernel = _make_agent_kernel(num_layers)

    out_pad = pl.pallas_call(
        kernel,
        out_shape=jax.ShapeDtypeStruct((b_pad, f_pad), jnp.float32),
        grid=grid,
        in_specs=[
            pl.BlockSpec((blk_b, f_pad), lambda i: (i, 0)),                  # x tile
            pl.BlockSpec((num_layers, f_pad, f_pad), lambda i: (0, 0, 0)),   # weights (resident)
            pl.BlockSpec((num_layers, f_pad), lambda i: (0, 0)),             # biases  (resident)
        ],
        out_specs=pl.BlockSpec((blk_b, f_pad), lambda i: (i, 0)),
        compiler_params=pltpu.CompilerParams(
            dimension_semantics=("parallel",),  # shard batch tiles across TCs (v7x)
            vmem_limit_bytes=vmem_limit,
        ),
    )(x_pad, w_slab, b_slab)

    return out_pad[:batch, :out_dim]


def init_agent_params(key, in_dim, hidden_shape, out_dim):
    """Deterministic init mimicking PyTorch nn.Linear default (U[-1/sqrt(fan_in), +])."""
    dims = [in_dim] + list(hidden_shape) + [out_dim]
    params = []
    for i in range(len(dims) - 1):
        fan_in, fan_out = dims[i], dims[i + 1]
        key, kw, kb = jax.random.split(key, 3)
        bound = 1.0 / jnp.sqrt(jnp.float32(fan_in))
        w = jax.random.uniform(kw, (fan_in, fan_out), jnp.float32, -bound, bound)
        b = jax.random.uniform(kb, (1, fan_out), jnp.float32, -bound, bound)
        params.append((w, b))
    return params


def agent_forward_ref(x, params):
    """Pure-JAX reference for verification."""
    h = x
    for w, b in params[:-1]:
        h = jnp.maximum(h @ w + b, 0.0)
    wo, bo = params[-1]
    logits = h @ wo + bo
    return jax.nn.softmax(logits, axis=1)


if __name__ == "__main__":
    key = jax.random.PRNGKey(0)

    in_dim = 16
    hidden_shape = [32, 32]
    out_dim = 8

    key, kp = jax.random.split(key)
    params = init_agent_params(kp, in_dim, hidden_shape, out_dim)

    # Pack padded slabs ONCE (per parameter update), not per forward call.
    w_slab, b_slab, od = pack_agent_params(params)

    # Small batch (matches the module's typical policy-gradient use).
    key, kx = jax.random.split(key)
    x_small = jax.random.normal(kx, (8, in_dim), jnp.float32)
    out_small = jax.block_until_ready(
        agent_forward(x_small, w_slab, b_slab, out_dim=od)
    )
    ref_small = agent_forward_ref(x_small, params)
    assert out_small.shape == (8, out_dim)
    assert jnp.allclose(out_small, ref_small, atol=1e-5, rtol=1e-5)
    assert jnp.allclose(jnp.sum(out_small, axis=1), 1.0, atol=1e-5)

    # Larger batch: exercises the 2-tile "parallel" grid and tight row padding
    # (300 -> 2x152 = 304 rows instead of 512).
    key, kx2 = jax.random.split(key)
    x_big = jax.random.normal(kx2, (300, in_dim), jnp.float32)
    out_big = jax.block_until_ready(
        agent_forward(x_big, w_slab, b_slab, out_dim=od)
    )
    ref_big = agent_forward_ref(x_big, params)
    assert out_big.shape == (300, out_dim)
    assert jnp.allclose(out_big, ref_big, atol=1e-5, rtol=1e-5)
    assert jnp.allclose(jnp.sum(out_big, axis=1), 1.0, atol=1e-5)

    print("KERNEL_OK")
</pallas_src>

<mosaic_0001>
module attributes {stable_mosaic.version = 11 : i64} {
  func.func @kernel(%arg0: i32, %arg1: memref<8x128xf32, #tpu.memory_space<vmem>>, %arg2: memref<3x128x128xf32, #tpu.memory_space<vmem>>, %arg3: memref<3x128xf32, #tpu.memory_space<vmem>>, %arg4: memref<8x128xf32, #tpu.memory_space<vmem>>) attributes {dimension_semantics = [#tpu.dimension_semantics<parallel>], iteration_bounds = array<i64: 1>, scalar_prefetch = 0 : i64, scratch_operands = 0 : i64, tpu.core_type = #tpu.core_type<tc>, window_params = [{transform_indices = @transform_0, window_bounds = array<i64: 8, 128>}, {pipeline_mode = #tpu.pipeline_mode<synchronous>, transform_indices = @transform_1, window_bounds = array<i64: 3, 128, 128>}, {pipeline_mode = #tpu.pipeline_mode<synchronous>, transform_indices = @transform_2, window_bounds = array<i64: 3, 128>}, {transform_indices = @transform_3, window_bounds = array<i64: 8, 128>}]} {
    %c0 = arith.constant 0 : index
    %c0_0 = arith.constant 0 : index
    %0 = vector.load %arg1[%c0, %c0_0] : memref<8x128xf32, #tpu.memory_space<vmem>>, vector<8x128xf32>
    %c0_1 = arith.constant 0 : index
    %c0_2 = arith.constant 0 : index
    %1 = vector.load %arg3[%c0_1, %c0_2] : memref<3x128xf32, #tpu.memory_space<vmem>>, vector<1x128xf32>
    %c0_3 = arith.constant 0 : index
    %c0_4 = arith.constant 0 : index
    %c0_5 = arith.constant 0 : index
    %2 = vector.load %arg2[%c0_3, %c0_4, %c0_5] : memref<3x128x128xf32, #tpu.memory_space<vmem>>, vector<1x128x128xf32>
    %3 = vector.shape_cast %2 : vector<1x128x128xf32> to vector<128x128xf32>
    %cst = arith.constant dense<0.000000e+00> : vector<8x128xf32>
    %4 = tpu.matmul %0, %3, %cst {dimension_numbers = #tpu.dot_dimension_numbers<[1], [0], [0], [1], [0, 0, 1, 1], [], []>} : vector<8x128xf32>, vector<128x128xf32>, vector<8x128xf32> -> vector<8x128xf32>
    %5 = vector.broadcast %1 : vector<1x128xf32> to vector<8x128xf32>
    %6 = arith.addf %4, %5 : vector<8x128xf32>
    %cst_6 = arith.constant 0.000000e+00 : f32
    %7 = vector.broadcast %cst_6 : f32 to vector<8x128xf32>
    %8 = arith.maximumf %6, %7 : vector<8x128xf32>
    %c1 = arith.constant 1 : index
    %c0_7 = arith.constant 0 : index
    %9 = vector.load %arg3[%c1, %c0_7] : memref<3x128xf32, #tpu.memory_space<vmem>>, vector<1x128xf32>
    %c1_8 = arith.constant 1 : index
    %c0_9 = arith.constant 0 : index
    %c0_10 = arith.constant 0 : index
    %10 = vector.load %arg2[%c1_8, %c0_9, %c0_10] : memref<3x128x128xf32, #tpu.memory_space<vmem>>, vector<1x128x128xf32>
    %11 = vector.shape_cast %10 : vector<1x128x128xf32> to vector<128x128xf32>
    %cst_11 = arith.constant dense<0.000000e+00> : vector<8x128xf32>
    %12 = tpu.matmul %8, %11, %cst_11 {dimension_numbers = #tpu.dot_dimension_numbers<[1], [0], [0], [1], [0, 0, 1, 1], [], []>} : vector<8x128xf32>, vector<128x128xf32>, vector<8x128xf32> -> vector<8x128xf32>
    %13 = vector.broadcast %9 : vector<1x128xf32> to vector<8x128xf32>
    %14 = arith.addf %12, %13 : vector<8x128xf32>
    %cst_12 = arith.constant 0.000000e+00 : f32
    %15 = vector.broadcast %cst_12 : f32 to vector<8x128xf32>
    %16 = arith.maximumf %14, %15 : vector<8x128xf32>
    %c2 = arith.constant 2 : index
    %c0_13 = arith.constant 0 : index
    %c0_14 = arith.constant 0 : index
    %17 = vector.load %arg2[%c2, %c0_13, %c0_14] : memref<3x128x128xf32, #tpu.memory_space<vmem>>, vector<1x128x128xf32>
    %18 = vector.shape_cast %17 : vector<1x128x128xf32> to vector<128x128xf32>
    %cst_15 = arith.constant dense<0.000000e+00> : vector<8x128xf32>
    %19 = tpu.matmul %16, %18, %cst_15 {dimension_numbers = #tpu.dot_dimension_numbers<[1], [0], [0], [1], [0, 0, 1, 1], [], []>} : vector<8x128xf32>, vector<128x128xf32>, vector<8x128xf32> -> vector<8x128xf32>
    %c2_16 = arith.constant 2 : index
    %c0_17 = arith.constant 0 : index
    %20 = vector.load %arg3[%c2_16, %c0_17] : memref<3x128xf32, #tpu.memory_space<vmem>>, vector<1x128xf32>
    %21 = vector.broadcast %20 : vector<1x128xf32> to vector<8x128xf32>
    %22 = arith.addf %19, %21 : vector<8x128xf32>
    %cst_18 = arith.constant dense<0xFF800000> : vector<8xf32>
    %23 = vector.multi_reduction <maximumf>, %22, %cst_18 [1] : vector<8x128xf32> to vector<8xf32>
    %24 = vector.shape_cast %23 : vector<8xf32> to vector<8x1xf32>
    %25 = vector.broadcast %24 : vector<8x1xf32> to vector<8x128xf32>
    %26 = arith.subf %22, %25 : vector<8x128xf32>
    %27 = math.exp %26 : vector<8x128xf32>
    %cst_19 = arith.constant dense<0.000000e+00> : vector<8xf32>
    %28 = vector.multi_reduction <add>, %27, %cst_19 [1] : vector<8x128xf32> to vector<8xf32>
    %29 = vector.shape_cast %28 : vector<8xf32> to vector<8x1xf32>
    %30 = tpu.reciprocal %29 {approx = true} : vector<8x1xf32> -> vector<8x1xf32>
    %31 = arith.mulf %29, %30 : vector<8x1xf32>
    %cst_20 = arith.constant 2.000000e+00 : f32
    %32 = vector.broadcast %cst_20 : f32 to vector<8x1xf32>
    %33 = arith.subf %32, %31 : vector<8x1xf32>
    %34 = arith.mulf %30, %33 : vector<8x1xf32>
    %35 = vector.broadcast %34 : vector<8x1xf32> to vector<8x128xf32>
    %36 = arith.mulf %27, %35 : vector<8x128xf32>
    %c0_21 = arith.constant 0 : index
    %c0_22 = arith.constant 0 : index
    %37 = vector.load %arg4[%c0_21, %c0_22] : memref<8x128xf32, #tpu.memory_space<vmem>>, vector<8x128xf32>
    tpu.vector_store %arg4[%c0_21, %c0_22], %36 {strides = array<i32>} : memref<8x128xf32, #tpu.memory_space<vmem>>, vector<8x128xf32>,
    return
  }
  func.func @transform_0(%arg0: i32) -> (i32, i32) {
    %c0_i32 = arith.constant 0 : i32
    %c0_i32_0 = arith.constant 0 : i32
    return %arg0, %c0_i32 : i32, i32
  }
  func.func @transform_1(%arg0: i32) -> (i32, i32, i32) {
    %c0_i32 = arith.constant 0 : i32
    %c0_i32_0 = arith.constant 0 : i32
    %c0_i32_1 = arith.constant 0 : i32
    %c0_i32_2 = arith.constant 0 : i32
    return %c0_i32, %c0_i32_0, %c0_i32_1 : i32, i32, i32
  }
  func.func @transform_2(%arg0: i32) -> (i32, i32) {
    %c0_i32 = arith.constant 0 : i32
    %c0_i32_0 = arith.constant 0 : i32
    %c0_i32_1 = arith.constant 0 : i32
    return %c0_i32, %c0_i32_0 : i32, i32
  }
  func.func @transform_3(%arg0: i32) -> (i32, i32) {
    %c0_i32 = arith.constant 0 : i32
    %c0_i32_0 = arith.constant 0 : i32
    return %arg0, %c0_i32 : i32, i32
  }
}

</mosaic_0001>

<bundles_post_ra>
// kernel: agent_forward.1
= control target key start
LH: loop header
LB: loop body
LE: loop exit
PB: predicated region body
PF: predicated region fallthrough
CT: control target
= control target key end

     0   :  { %8 = vsyncpa [#allocation3], 0  ;;  %s718_s0 = inlined_call_operand.vmem [shape: f32[8,128], index: 0, kind: input, shape index: {}]   ;;  %s719_s1 = inlined_call_operand.hbm [shape: f32[3,128,128], index: 1, kind: input, shape index: {}]   ;;  %s720_s2 = inlined_call_operand.vmem [shape: f32[3,128], index: 2, kind: input, shape index: {}]   ;;  %s721_s3 = inlined_call_operand.hbm [shape: f32[8,128], index: 3, kind: output, shape index: {}]  }
   0x1   :  { %9 = vsyncpa [#allocation4], 0  ;;  %s625_s12 = smov [#allocation2]   ;;  %s577_s16 = scalar_lea.hbm %s719_s1, 6144 }
   0x2   :  { %s17_s13 = sshll.u32 %s625_s12, 4  ;;  %p578_p0 = scmp.ne.s32.totalorder %s719_s1, %s577_s16  ;;  %s18_s13 = int_to_ptr.vmem [resolvable:$true] %s17_s13 }
   0x3   :  { %p581_p1 = scmp.lt.u32.totalorder %s577_s16, %s719_s1 }
   0x5   :  { %p583_p2 = pnand %p581_p1, %p578_p0 }
   0x7   :  { %586 = shalt.err (!%p583_p2)
}
   0x8   :  { %s587_s21 = scalar_lea.vmem %s18_s13, 6144  ;;  %p592_p4 = scmp.lt.s32.totalorder %s18_s13, %s18_s13 }
   0x9   :  { %p588_p3 = scmp.ne.s32.totalorder %s18_s13, %s587_s21  ;;  %p593_p5 = scmp.lt.s32.totalorder %s587_s21, %s587_s21 }
   0xb   :  { %p594_p6 = por %p593_p5, %p592_p4 }
   0xd   :  { %p595_p7 = pnand %p594_p6, %p588_p3 }
   0xf   :  { %598 = shalt.err (!%p595_p7)
}
  0x10   :  { %s626_s22 = smov 128   ;;  %s627_s23 = smov 8  }
  0x11   :  { %23 = dma.hbm_to_vmem [thread:$0]  %s719_s1, 6144, %s18_s13, [#allocation3], %s626_s22, %s626_s22, %s627_s23  }
  0x12   :  { %621 = dma.done.wait [#allocation3], 6144  }
  0x13   :  { %622 = vsyncadd [#allocation3], 4294961152  ;;  %v628_v0 = vmov 0.0|0.0   ;;  %vm629_vm0 = vmmov 0   ;;  %v630_v1 = vmov 0.0   ;;  %v31_v2 = vld [vmem:[#allocation2] sm:$0xff] }
  0x14   :  { %494 = vmatprep.subr.bf16.mxu0 %v628_v0  ;;  %421 = vmatprep.mubr.msk.f32.mxu0 %vm629_vm0, %v630_v1  ;;  %v32_v3 = vld [vmem:[#allocation2 + $0x8] sm:$0xff]  ;;  %v33_v4 = vld [vmem:[#allocation2 + $0x10] sm:$0xff]  ;;  %v34_v6 = vld [vmem:[#allocation2 + $0x18] sm:$0xff]  ;;  %s631_s5 = smov [#allocation5]  }
  0x15   :  { %518 = vmatprep.subr.bf16.mxu1 %v628_v0  ;;  %456 = vmatprep.mubr.msk.f32.mxu1 %vm629_vm0, %v630_v1  ;;  %v495_v5 = vpack.c.bf16 %v32_v3, %v31_v2  ;;  %v498_v7 = vpack.c.bf16 %v34_v6, %v33_v4  ;;  %v35_v8 = vld [vmem:[#allocation2 + $0x20] sm:$0xff]  ;;  %v36_v9 = vld [vmem:[#allocation2 + $0x28] sm:$0xff]  ;;  %v126_v12 = vld [vmem:[#allocation2 + $0x90] sm:$0xff]  ;;  %s326_s6 = sshll.u32 %s631_s5, 4  ;;  %s327_s6 = int_to_ptr.vmem [resolvable:$true] %s326_s6 }
  0x16   :  { %v124_v10 = vld [vmem:[#allocation2 + $0x80] sm:$0xff]  ;;  %v125_v11 = vld [vmem:[#allocation2 + $0x88] sm:$0xff]  ;;  %v127_v13 = vld [vmem:[#allocation2 + $0x98] sm:$0xff]  ;;  %v501_v14 = vpack.c.bf16 %v36_v9, %v35_v8  ;;  %p604_p9 = scmp.lt.s32.totalorder %s327_s6, %s327_s6 }
  0x17   :  { %496 = vmatpush3.bf16.msra.mxu0 %v495_v5  ;;  %v519_v15 = vpack.c.bf16 %v125_v11, %v124_v10  ;;  %v37_v16 = vld [vmem:[#allocation2 + $0x30] sm:$0xff]  ;;  %v38_v17 = vld [vmem:[#allocation2 + $0x38] sm:$0xff]  ;;  %v522_v18 = vpack.c.bf16 %v127_v13, %v126_v12  ;;  %v128_v19 = vld [vmem:[#allocation2 + $0xa0] sm:$0xff] }
  0x18   :  { %497 = vmatprep.subr.bf16.mxu0 %v628_v0  ;;  %v129_v20 = vld [vmem:[#allocation2 + $0xa8] sm:$0xff]  ;;  %v504_v21 = vpack.c.bf16 %v38_v17, %v37_v16  ;;  %v39_v22 = vld [vmem:[#allocation2 + $0x40] sm:$0xff]  ;;  %v130_v25 = vld [vmem:[#allocation2 + $0xb0] sm:$0xff] }
  0x19   :  { %520 = vmatpush3.bf16.msra.mxu1 %v519_v15  ;;  %v40_v23 = vld [vmem:[#allocation2 + $0x48] sm:$0xff]  ;;  %v525_v24 = vpack.c.bf16 %v129_v20, %v128_v19  ;;  %v131_v26 = vld [vmem:[#allocation2 + $0xb8] sm:$0xff]  ;;  %v41_v28 = vld [vmem:[#allocation2 + $0x50] sm:$0xff] }
  0x1a   :  { %521 = vmatprep.subr.bf16.mxu1 %v628_v0  ;;  %v507_v27 = vpack.c.bf16 %v40_v23, %v39_v22  ;;  %v42_v29 = vld [vmem:[#allocation2 + $0x58] sm:$0xff]  ;;  %v528_v30 = vpack.c.bf16 %v131_v26, %v130_v25  ;;  %v132_v31 = vld [vmem:[#allocation2 + $0xc0] sm:$0xff]  ;;  %v133_v32 = vld [vmem:[#allocation2 + $0xc8] sm:$0xff] }
  0x1b   :  { %499 = vmatpush3.bf16.msra.mxu0 %v498_v7  ;;  %v510_v33 = vpack.c.bf16 %v42_v29, %v41_v28  ;;  %v43_v34 = vld [vmem:[#allocation2 + $0x60] sm:$0xff]  ;;  %v44_v35 = vld [vmem:[#allocation2 + $0x68] sm:$0xff]  ;;  %v531_v36 = vpack.c.bf16 %v133_v32, %v132_v31  ;;  %v134_v37 = vld [vmem:[#allocation2 + $0xd0] sm:$0xff] }
  0x1c   :  { %500 = vmatprep.subr.bf16.mxu0 %v628_v0  ;;  %v135_v38 = vld [vmem:[#allocation2 + $0xd8] sm:$0xff]  ;;  %v513_v39 = vpack.c.bf16 %v44_v35, %v43_v34  ;;  %v45_v40 = vld [vmem:[#allocation2 + $0x70] sm:$0xff]  ;;  %v136_v43 = vld [vmem:[#allocation2 + $0xe0] sm:$0xff] }
  0x1d   :  { %523 = vmatpush3.bf16.msra.mxu1 %v522_v18  ;;  %v46_v41 = vld [vmem:[#allocation2 + $0x78] sm:$0xff]  ;;  %v534_v42 = vpack.c.bf16 %v135_v38, %v134_v37  ;;  %v137_v44 = vld [vmem:[#allocation2 + $0xe8] sm:$0xff]  ;;  %v29_v47 = vld [vmem:[%s718_s0] sm:$0xff] }
  0x1e   :  { %524 = vmatprep.subr.bf16.mxu1 %v628_v0  ;;  %v516_v45 = vpack.c.bf16 %v46_v41, %v45_v40  ;;  %v537_v46 = vpack.c.bf16 %v137_v44, %v136_v43  ;;  %v138_v48 = vld [vmem:[#allocation2 + $0xf0] sm:$0xff]  ;;  %v139_v49 = vld [vmem:[#allocation2 + $0xf8] sm:$0xff]  ;;  %v216_v51 = vld [vmem:[#allocation2 + $0x100] sm:$0xff] }
  0x1f   :  { %502 = vmatpush3.bf16.msra.mxu0 %v501_v14  ;;  %v540_v50 = vpack.c.bf16 %v139_v49, %v138_v48  ;;  %v217_v52 = vld [vmem:[#allocation2 + $0x108] sm:$0xff]  ;;  %v218_v53 = vld [vmem:[#allocation2 + $0x110] sm:$0xff]  ;;  %v219_v55 = vld [vmem:[#allocation2 + $0x118] sm:$0xff] }
  0x20   :  { %503 = vmatprep.subr.bf16.mxu0 %v628_v0  ;;  %v543_v54 = vpack.c.bf16 %v217_v52, %v216_v51  ;;  %v546_v56 = vpack.c.bf16 %v219_v55, %v218_v53  ;;  %v220_v57 = vld [vmem:[#allocation2 + $0x120] sm:$0xff]  ;;  %v221_v58 = vld [vmem:[#allocation2 + $0x128] sm:$0xff]  ;;  %v222_v60 = vld [vmem:[#allocation2 + $0x130] sm:$0xff] }
  0x21   :  { %526 = vmatpush3.bf16.msra.mxu1 %v525_v24  ;;  %v549_v59 = vpack.c.bf16 %v221_v58, %v220_v57  ;;  %v223_v61 = vld [vmem:[#allocation2 + $0x138] sm:$0xff]  ;;  %v224_v63 = vld [vmem:[#allocation2 + $0x140] sm:$0xff]  ;;  %v226_v3 = vld [vmem:[#allocation2 + $0x150] sm:$0xff] }
  0x22   :  { %527 = vmatprep.subr.bf16.mxu1 %v628_v0  ;;  %v552_v62 = vpack.c.bf16 %v223_v61, %v222_v60  ;;  %v227_v4 = vld [vmem:[#allocation2 + $0x158] sm:$0xff]  ;;  %v228_v6 = vld [vmem:[#allocation2 + $0x160] sm:$0xff]  ;;  %v229_v7 = vld [vmem:[#allocation2 + $0x168] sm:$0xff] }
  0x23   :  { %505 = vmatpush3.bf16.msra.mxu0 %v504_v21  ;;  %v558_v5 = vpack.c.bf16 %v227_v4, %v226_v3  ;;  %v561_v8 = vpack.c.bf16 %v229_v7, %v228_v6  ;;  %v335_v9 = vld [vmem:[%s720_s2] ss:$0 sm:$0xff]  ;;  %v230_v14 = vld [vmem:[#allocation2 + $0x170] sm:$0xff]  ;;  %v231_v15 = vld [vmem:[#allocation2 + $0x178] sm:$0xff] }
  0x24   :  { %506 = vmatprep.subr.bf16.mxu0 %v628_v0  ;;  %v564_v16 = vpack.c.bf16 %v231_v15, %v230_v14  ;;  %v336_v17 = vld [vmem:[%s720_s2 + $0x1] ss:$0 sm:$0xff]  ;;  %v337_v21 = vld [vmem:[%s720_s2 + $0x2] ss:$0 sm:$0xff]  ;;  %s599_s2 = scalar_lea.vmem %s327_s6, 128 }
  0x25   :  { %529 = vmatpush3.bf16.msra.mxu1 %v528_v30  ;;  %p600_p8 = scmp.ne.s32.totalorder %s327_s6, %s599_s2  ;;  %p605_p10 = scmp.lt.s32.totalorder %s599_s2, %s599_s2 }
  0x26   :  { %530 = vmatprep.subr.bf16.mxu1 %v628_v0 }
  0x27   :  { %508 = vmatpush3.bf16.msra.mxu0 %v507_v27  ;;  %p606_p11 = por %p605_p10, %p604_p9 }
  0x28   :  { %509 = vmatprep.subr.bf16.mxu0 %v628_v0 }
  0x29   :  { %532 = vmatpush3.bf16.msra.mxu1 %v531_v36  ;;  %p607_p12 = pnand %p606_p11, %p600_p8 }
  0x2a   :  { %533 = vmatprep.subr.bf16.mxu1 %v628_v0 }
  0x2b   :  { %511 = vmatpush3.bf16.msra.mxu0 %v510_v33 }
  0x2c   :  { %512 = vmatprep.subr.bf16.mxu0 %v628_v0 }
  0x2d   :  { %535 = vmatpush3.bf16.msra.mxu1 %v534_v42 }
  0x2e   :  { %536 = vmatprep.subr.bf16.mxu1 %v628_v0 }
  0x2f   :  { %514 = vmatpush3.bf16.msra.mxu0 %v513_v39 }
  0x30   :  { %515 = vmatprep.subr.bf16.mxu0 %v628_v0 }
  0x31   :  { %538 = vmatpush3.bf16.msra.mxu1 %v537_v46 }
  0x32   :  { %539 = vmatprep.subr.bf16.mxu1 %v628_v0 }
  0x33   :  { %517 = vmatpush3.bf16.msra.mxu0 %v516_v45 }
  0x34   :  { %542 = vmatprep.subr.bf16.mxu0 %v628_v0 }
  0x35   :  { %541 = vmatpush3.bf16.msra.mxu1 %v540_v50 }
  0x36   :  { %422 = vmatmul.mubr.f32.vlgmr.msra.gmra.mrb[0].mxu0 %v29_v47 }
  0x37   :  { %491 = vmatprep.mubr.msk.f32.mxu0 %vm629_vm0, %v630_v1  ;;  %544 = vmatpush3.bf16.msra.mxu0 %v543_v54  ;;  %v225_v1 = vld [vmem:[#allocation2 + $0x148] sm:$0xff] }
  0x38   :  { %545 = vmatprep.subr.bf16.mxu0 %v628_v0  ;;  %v555_v2 = vpack.c.bf16 %v225_v1, %v224_v63 }
  0x3b   :  { %547 = vmatpush3.bf16.msra.mxu0 %v546_v56 }
  0x3c   :  { %548 = vmatprep.subr.bf16.mxu0 %v628_v0 }
  0x3f   :  { %550 = vmatpush3.bf16.msra.mxu0 %v549_v59 }
  0x40   :  { %551 = vmatprep.subr.bf16.mxu0 %v628_v0 }
  0x43   :  { %553 = vmatpush3.bf16.msra.mxu0 %v552_v62 }
  0x44   :  { %554 = vmatprep.subr.bf16.mxu0 %v628_v0 }
  0x47   :  { %556 = vmatpush3.bf16.msra.mxu0 %v555_v2 }
  0x48   :  { %557 = vmatprep.subr.bf16.mxu0 %v628_v0 }
  0x4b   :  { %559 = vmatpush3.bf16.msra.mxu0 %v558_v5 }
  0x4c   :  { %560 = vmatprep.subr.bf16.mxu0 %v628_v0 }
  0x4f   :  { %562 = vmatpush3.bf16.msra.mxu0 %v561_v8 }
  0x50   :  { %563 = vmatprep.subr.bf16.mxu0 %v628_v0 }
  0x53   :  { %565 = vmatpush3.bf16.msra.mxu0 %v564_v16 }
 0x109   :  { %v117_v10 = vpop.f32.mrb[0].mxu0 }
 0x10a   :  { %v118_v11 = vadd.f32 %v335_v9, %v117_v10  ;;  %v423_v12 = vpop.f32.mrb[1].mxu0 }
 0x10c   :  { %v121_v13 = vmax.f32 %v118_v11, 0.0 }
 0x10e   :  { %457 = vmatmul.mubr.f32.vlgmr.msra.gmra.mrb[0].mxu1 %v121_v13 }
 0x1e1   :  { %v210_v18 = vpop.f32.mrb[0].mxu1 }
 0x1e2   :  { %v211_v19 = vadd.f32 %v336_v17, %v210_v18  ;;  %v458_v0 = vpop.f32.mrb[1].mxu1 }
 0x1e4   :  { %v214_v20 = vmax.f32 %v211_v19, 0.0 }
 0x1e6   :  { %492 = vmatmul.mubr.f32.vlgmr.msra.gmra.mrb[2].mxu0 %v214_v20 }
 0x2b9   :  { %v303_v22 = vpop.f32.mrb[2].mxu0 }
 0x2ba   :  { %v304_v23 = vadd.f32 %v337_v21, %v303_v22  ;;  %v493_v24 = vpop.f32.mrb[3].mxu0 }
 0x2bc   :  { %307 = vmax.xlane.f32.xlu0 %v304_v23 }
 0x349   :  { %v308_v25 = vpop.xlane.xlu0 %307 }
 0x34a   :  { %v309_v26 = vsub.f32 %v304_v23, %v308_v25 }
 0x34c   :  { %v310_v27 = vmul.f32 1.442695, %v309_v26 }
 0x34e   :  { %573 = vpow2.f32 %v310_v27 }
 0x358   :  { %v574_v28 = vpop.eup %573 }
 0x359   :  { %312 = vadd.xlane.f32.xlu0 %v574_v28 }
 0x3e6   :  { %v313_v29 = vpop.xlane.xlu0 %312 }
 0x3e7   :  { %575 = vrcp.f32 %v313_v29 }
 0x3f1   :  { %v576_v30 = vpop.eup %575 }
 0x3f2   :  { %v315_v31 = vmul.f32 %v576_v30, %v313_v29 }
 0x3f4   :  { %v316_v32 = vsub.f32 2.0, %v315_v31 }
 0x3f6   :  { %v317_v33 = vmul.f32 %v576_v30, %v316_v32 }
 0x3f8   :  { %v318_v34 = vmul.f32 %v574_v28, %v317_v33 }
 0x3fa   :  { %319 = vst [vmem:[#allocation5] sm:$0xff] %v318_v34 }
 0x3fb   :  { %610 = shalt.err (!%p607_p12)
}
 0x3fc   :  { %s611_s9 = scalar_lea.hbm %s721_s3, 128 }
 0x3fd   :  { %p612_p13 = scmp.ne.s32.totalorder %s721_s3, %s611_s9  ;;  %p615_p0 = scmp.lt.u32.totalorder %s611_s9, %s721_s3 }
 0x3ff   :  { %p617_p1 = pnand %p615_p0, %p612_p13 }
 0x401   :  { %620 = shalt.err (!%p617_p1)
}
 0x402   :  { %329 = dma.vmem_to_hbm [thread:$0]  %s327_s6, 128, %s721_s3, [#allocation4]  }
 0x403   :  { %623 = dma.done.wait [#allocation4], 128  }
 0x404   :  { %624 = vsyncadd [#allocation4], 4294967168 }
 0x405   :  { %333 = vsyncpa [#allocation3], 1 }
 0x406   :  { %334 = vsyncpa [#allocation4], 1 }

</bundles_post_ra>
